<compile_context>
chip_gen: v7x
topology: tpu7x:2x2x1
jax: 0.10.0
libtpu: 0.0.40
codegen_flags: <defaults>
</compile_context>

<pallas_src>
import jax
import jax.numpy as jnp
from jax import lax
from jax.experimental import pallas as pl
from jax.experimental.pallas import tpu as pltpu


def _round_up(x: int, m: int) -> int:
    return ((x + m - 1) // m) * m


def _min_sublane(dtype) -> int:
    # Minimum sublane tiling: f32 -> 8, bf16 -> 16, int8/fp8 -> 32.
    return {4: 8, 2: 16, 1: 32}.get(jnp.dtype(dtype).itemsize, 8)


# --------------------------------------------------------------------------
# Kernels
# --------------------------------------------------------------------------
def _linear_small_kernel(x_ref, w_ref, b_ref, o_ref):
    # x: (tm, Kp), w: (Np, Kp)  [PyTorch (Dout, Din) orientation], b: (1, Np)
    acc = lax.dot_general(
        x_ref[...], w_ref[...],
        dimension_numbers=(((1,), (1,)), ((), ())),      # contract on Din
        preferred_element_type=jnp.float32,
    )
    o_ref[...] = (acc + b_ref[...].astype(jnp.float32)).astype(o_ref.dtype)


def _linear_tiled_kernel(x_ref, w_ref, b_ref, o_ref, acc_ref):
    # x: (tm, tk), w: (tn, tk), b: (1, tn), o: (tm, tn), acc: (tm, tn) f32
    k = pl.program_id(2)

    @pl.when(k == 0)
    def _init():
        # Bias folded into the accumulator init (saves an epilogue VPU add).
        acc_ref[...] = jnp.broadcast_to(
            b_ref[...].astype(jnp.float32), acc_ref.shape)

    acc_ref[...] += lax.dot_general(
        x_ref[...], w_ref[...],
        dimension_numbers=(((1,), (1,)), ((), ())),      # MXU-native trans-RHS
        preferred_element_type=jnp.float32,
    )

    @pl.when(k == pl.num_programs(2) - 1)
    def _finalize():
        o_ref[...] = acc_ref[...].astype(o_ref.dtype)


# --------------------------------------------------------------------------
# Wrapper
# --------------------------------------------------------------------------
def linear_forward(x, weight, bias, *, tm=None, tn=None, tk=None,
                   compute_dtype=None):
    """y = x @ weight.T + bias   (PyTorch nn.Linear convention).

    weight: (Dout, Din), bias: (Dout,).  compute_dtype=jnp.bfloat16 optionally
    casts the MXU inputs (f32 accumulation / output dtype preserved).
    """
    B, Din = x.shape
    Dout, Din_w = weight.shape
    assert Din_w == Din, "weight must be (Dout, Din)"
    out_dtype = x.dtype

    if compute_dtype is not None:
        x = x.astype(compute_dtype)
        weight = weight.astype(compute_dtype)

    in_dtype = x.dtype
    item = jnp.dtype(in_dtype).itemsize
    out_item = jnp.dtype(out_dtype).itemsize
    sub = _min_sublane(in_dtype)

    Kp_full = _round_up(Din, 128)
    Np_min = _round_up(Dout, 128)

    # -------- small-weight fast path: weight fully VMEM-resident, no K axis --
    if tk is None and Kp_full * Np_min * item <= 4 * 1024 * 1024:
        tm_s = tm if tm is not None else min(512, _round_up(B, sub))
        Mp = _round_up(B, tm_s)
        Kp, Np = Kp_full, Np_min

        x_p = x if (Mp == B and Kp == Din) else jnp.pad(
            x, ((0, Mp - B), (0, Kp - Din)))
        w_p = weight if (Np == Dout and Kp == Din) else jnp.pad(
            weight, ((0, Np - Dout), (0, Kp - Din)))
        b_p = (bias if Np == Dout else jnp.pad(bias, (0, Np - Dout))).reshape(1, Np)

        vmem = (2 * tm_s * Kp * item + Np * Kp * item
                + 2 * tm_s * Np * out_item + 8 * Np * item + (1 << 20))

        out_p = pl.pallas_call(
            _linear_small_kernel,
            out_shape=jax.ShapeDtypeStruct((Mp, Np), out_dtype),
            grid=(Mp // tm_s,),
            in_specs=[
                pl.BlockSpec((tm_s, Kp), lambda i: (i, 0)),   # x tile
                pl.BlockSpec((Np, Kp), lambda i: (0, 0)),     # whole weight, resident
                pl.BlockSpec((1, Np), lambda i: (0, 0)),      # whole bias, resident
            ],
            out_specs=pl.BlockSpec((tm_s, Np), lambda i: (i, 0)),
            compiler_params=pltpu.CompilerParams(
                dimension_semantics=("parallel",),
                vmem_limit_bytes=min(100 << 20, max(32 << 20, int(vmem))),
            ),
            cost_estimate=pl.CostEstimate(
                flops=2 * Mp * Kp * Np,
                transcendentals=0,
                bytes_accessed=(Mp * Kp + Np * Kp + Np) * item + Mp * Np * out_item,
            ),
        )(x_p, w_p, b_p)
        return out_p[:B, :Dout]

    # -------- general K-tiled path ------------------------------------------
    tm = tm if tm is not None else min(512, _round_up(B, sub))
    tn = tn if tn is not None else min(512, Np_min)
    tk_cap = 2048 if item <= 2 else 1024          # keep f32 working set v7x-safe
    tk = tk if tk is not None else min(tk_cap, Kp_full)

    Mp = _round_up(B, tm)
    Np = _round_up(Dout, tn)
    Kp = _round_up(Din, tk)

    # v7x (2 TC/chip): make sure a parallel axis has >= 2 blocks when possible.
    if (Mp // tm) * (Np // tn) < 2:
        if Np >= 256:
            tn = max(128, _round_up(Np // 2, 128))
            Np = _round_up(Dout, tn)
        elif Mp >= 2 * sub:
            tm = max(sub, _round_up(Mp // 2, sub))
            Mp = _round_up(B, tm)

    x_p = x if (Mp == B and Kp == Din) else jnp.pad(
        x, ((0, Mp - B), (0, Kp - Din)))
    w_p = weight if (Np == Dout and Kp == Din) else jnp.pad(
        weight, ((0, Np - Dout), (0, Kp - Din)))
    b_p = (bias if Np == Dout else jnp.pad(bias, (0, Np - Dout))).reshape(1, Np)

    grid = (Mp // tm, Np // tn, Kp // tk)
    gm, gn, _ = grid

    # Double-buffered x/W/out tiles + f32 accumulator (+ bias + slack).
    vmem = (2 * (tm * tk + tn * tk) * item + 2 * tm * tn * out_item
            + tm * tn * 4 + 2 * 8 * tn * item + (2 << 20))

    out_p = pl.pallas_call(
        _linear_tiled_kernel,
        out_shape=jax.ShapeDtypeStruct((Mp, Np), out_dtype),
        grid=grid,
        in_specs=[
            pl.BlockSpec((tm, tk), lambda i, j, k: (i, k)),   # x tile
            pl.BlockSpec((tn, tk), lambda i, j, k: (j, k)),   # W tile, (Dout, Din) orientation
            pl.BlockSpec((1, tn), lambda i, j, k: (0, j)),    # bias per N tile
        ],
        out_specs=pl.BlockSpec((tm, tn), lambda i, j, k: (i, j)),
        scratch_shapes=[pltpu.VMEM((tm, tn), jnp.float32)],
        compiler_params=pltpu.CompilerParams(
            dimension_semantics=("parallel", "parallel", "arbitrary"),
            vmem_limit_bytes=min(100 << 20, max(32 << 20, int(vmem))),
        ),
        cost_estimate=pl.CostEstimate(
            flops=2 * Mp * Kp * Np,
            transcendentals=0,
            # include re-reads: x is read once per N tile, W once per M tile
            bytes_accessed=(gn * Mp * Kp + gm * Np * Kp + Np) * item
                           + Mp * Np * out_item,
        ),
    )(x_p, w_p, b_p)
    return out_p[:B, :Dout]


if __name__ == "__main__":
    # --- spec-sized check (LinearRegression: nn.Linear(32, 8), batch=4) ------
    input_dim, output_dim, batch = 32, 8, 4
    key = jax.random.PRNGKey(0)
    kx, kw, kb = jax.random.split(key, 3)

    x = jax.random.normal(kx, (batch, input_dim), dtype=jnp.float32)
    # PyTorch default init: Uniform(-1/sqrt(fan_in), 1/sqrt(fan_in))
    bound = 1.0 / (input_dim ** 0.5)
    weight = jax.random.uniform(kw, (output_dim, input_dim),
                                minval=-bound, maxval=bound, dtype=jnp.float32)
    bias = jax.random.uniform(kb, (output_dim,),
                              minval=-bound, maxval=bound, dtype=jnp.float32)

    out = jax.block_until_ready(linear_forward(x, weight, bias))
    ref = x @ weight.T + bias
    assert out.shape == (batch, output_dim)
    assert jnp.allclose(out, ref, atol=1e-5, rtol=1e-5)

    # --- second check: exercises the K-tiled path (grid 1 x 3 x 2), bias-in-
    #     init accumulation, and N/K padding with non-aligned Dout.
    B2, Din2, Dout2 = 16, 2048, 1152
    k2x, k2w, k2b = jax.random.split(jax.random.PRNGKey(1), 3)
    bound2 = 1.0 / (Din2 ** 0.5)
    x2 = jax.random.normal(k2x, (B2, Din2), dtype=jnp.float32)
    w2 = jax.random.uniform(k2w, (Dout2, Din2),
                            minval=-bound2, maxval=bound2, dtype=jnp.float32)
    b2 = jax.random.uniform(k2b, (Dout2,),
                            minval=-bound2, maxval=bound2, dtype=jnp.float32)

    out2 = jax.block_until_ready(linear_forward(x2, w2, b2))
    ref2 = jnp.dot(x2, w2.T, precision=lax.Precision.HIGHEST) + b2
    assert out2.shape == (B2, Dout2)
    assert jnp.allclose(out2, ref2, atol=2e-3, rtol=2e-3)

    print("KERNEL_OK")
</pallas_src>

<mosaic_0001>
module attributes {stable_mosaic.version = 11 : i64} {
  func.func @_linear_small_kernel(%arg0: i32, %arg1: memref<8x128xf32, #tpu.memory_space<vmem>>, %arg2: memref<128x128xf32, #tpu.memory_space<vmem>>, %arg3: memref<1x128xf32, #tpu.memory_space<vmem>>, %arg4: memref<8x128xf32, #tpu.memory_space<vmem>>) attributes {dimension_semantics = [#tpu.dimension_semantics<parallel>], iteration_bounds = array<i64: 1>, scalar_prefetch = 0 : i64, scratch_operands = 0 : i64, tpu.core_type = #tpu.core_type<tc>, window_params = [{transform_indices = @transform_0, window_bounds = array<i64: 8, 128>}, {pipeline_mode = #tpu.pipeline_mode<synchronous>, transform_indices = @transform_1, window_bounds = array<i64: 128, 128>}, {pipeline_mode = #tpu.pipeline_mode<synchronous>, transform_indices = @transform_2, window_bounds = array<i64: 1, 128>}, {transform_indices = @transform_3, window_bounds = array<i64: 8, 128>}]} {
    %c0 = arith.constant 0 : index
    %c0_0 = arith.constant 0 : index
    %0 = vector.load %arg1[%c0, %c0_0] : memref<8x128xf32, #tpu.memory_space<vmem>>, vector<8x128xf32>
    %c0_1 = arith.constant 0 : index
    %c0_2 = arith.constant 0 : index
    %1 = vector.load %arg2[%c0_1, %c0_2] : memref<128x128xf32, #tpu.memory_space<vmem>>, vector<128x128xf32>
    %cst = arith.constant dense<0.000000e+00> : vector<8x128xf32>
    %2 = tpu.matmul %0, %1, %cst {dimension_numbers = #tpu.dot_dimension_numbers<[1], [1], [0], [0], [0, 0, 1, 0], [], []>} : vector<8x128xf32>, vector<128x128xf32>, vector<8x128xf32> -> vector<8x128xf32>
    %c0_3 = arith.constant 0 : index
    %c0_4 = arith.constant 0 : index
    %3 = vector.load %arg3[%c0_3, %c0_4] : memref<1x128xf32, #tpu.memory_space<vmem>>, vector<1x128xf32>
    %4 = vector.broadcast %3 : vector<1x128xf32> to vector<8x128xf32>
    %5 = arith.addf %2, %4 : vector<8x128xf32>
    %c0_5 = arith.constant 0 : index
    %c0_6 = arith.constant 0 : index
    %6 = vector.load %arg4[%c0_5, %c0_6] : memref<8x128xf32, #tpu.memory_space<vmem>>, vector<8x128xf32>
    tpu.vector_store %arg4[%c0_5, %c0_6], %5 {strides = array<i32>} : memref<8x128xf32, #tpu.memory_space<vmem>>, vector<8x128xf32>,
    return
  }
  func.func @transform_0(%arg0: i32) -> (i32, i32) {
    %c0_i32 = arith.constant 0 : i32
    %c0_i32_0 = arith.constant 0 : i32
    return %arg0, %c0_i32 : i32, i32
  }
  func.func @transform_1(%arg0: i32) -> (i32, i32) {
    %c0_i32 = arith.constant 0 : i32
    %c0_i32_0 = arith.constant 0 : i32
    %c0_i32_1 = arith.constant 0 : i32
    return %c0_i32, %c0_i32_0 : i32, i32
  }
  func.func @transform_2(%arg0: i32) -> (i32, i32) {
    %c0_i32 = arith.constant 0 : i32
    %c0_i32_0 = arith.constant 0 : i32
    %c0_i32_1 = arith.constant 0 : i32
    return %c0_i32, %c0_i32_0 : i32, i32
  }
  func.func @transform_3(%arg0: i32) -> (i32, i32) {
    %c0_i32 = arith.constant 0 : i32
    %c0_i32_0 = arith.constant 0 : i32
    return %arg0, %c0_i32 : i32, i32
  }
}

</mosaic_0001>

<bundles_post_ra>
// kernel: tpu_custom_call.1
= control target key start
LH: loop header
LB: loop body
LE: loop exit
PB: predicated region body
PF: predicated region fallthrough
CT: control target
= control target key end

     0   :  { %8 = vsyncpa [#allocation3], 0  ;;  %s383_s0 = inlined_call_operand.hbm [shape: f32[8,128], index: 0, kind: input, shape index: {}]   ;;  %s384_s1 = inlined_call_operand.hbm [shape: f32[128,128], index: 1, kind: input, shape index: {}]   ;;  %s385_s2 = inlined_call_operand.vmem [shape: f32[1,128], index: 2, kind: input, shape index: {}]   ;;  %s386_s3 = inlined_call_operand.hbm [shape: f32[8,128], index: 3, kind: output, shape index: {}]  }
   0x1   :  { %9 = vsyncpa [#allocation6], 0 }
   0x2   :  { %10 = vsyncpa [#allocation4], 0  ;;  %s309_s12 = smov [#allocation2]   ;;  %s310_s14 = smov [#allocation5]  }
   0x3   :  { %s17_s13 = sshll.u32 %s309_s12, 4  ;;  %s26_s15 = sshll.u32 %s310_s14, 4  ;;  %s18_s13 = int_to_ptr.vmem [resolvable:$true] %s17_s13  ;;  %s337_s15 = int_to_ptr.vmem [resolvable:$true] %s26_s15 }
   0x4   :  { %s237_s18 = scalar_lea.hbm %s383_s0, 128 }
   0x5   :  { %p238_p0 = scmp.ne.s32.totalorder %s383_s0, %s237_s18  ;;  %p241_p1 = scmp.lt.u32.totalorder %s237_s18, %s383_s0 }
   0x7   :  { %p243_p2 = pnand %p241_p1, %p238_p0 }
   0x9   :  { %246 = shalt.err (!%p243_p2)
}
   0xa   :  { %s247_s23 = scalar_lea.vmem %s18_s13, 128  ;;  %p252_p4 = scmp.lt.s32.totalorder %s18_s13, %s18_s13 }
   0xb   :  { %p248_p3 = scmp.ne.s32.totalorder %s18_s13, %s247_s23  ;;  %p253_p5 = scmp.lt.s32.totalorder %s247_s23, %s247_s23 }
   0xd   :  { %p254_p6 = por %p253_p5, %p252_p4 }
   0xf   :  { %p255_p7 = pnand %p254_p6, %p248_p3 }
  0x11   :  { %258 = shalt.err (!%p255_p7)
}
  0x12   :  { %20 = dma.hbm_to_vmem [thread:$0]  %s383_s0, 128, %s18_s13, [#allocation3]  }
  0x13   :  { %s259_s28 = scalar_lea.hbm %s384_s1, 2048 }
  0x14   :  { %p260_p8 = scmp.ne.s32.totalorder %s384_s1, %s259_s28  ;;  %p263_p9 = scmp.lt.u32.totalorder %s259_s28, %s384_s1 }
  0x16   :  { %p265_p10 = pnand %p263_p9, %p260_p8 }
  0x18   :  { %268 = shalt.err (!%p265_p10)
}
  0x19   :  { %s269_s6 = scalar_lea.vmem %s337_s15, 2048  ;;  %p274_p12 = scmp.lt.s32.totalorder %s337_s15, %s337_s15 }
  0x1a   :  { %p270_p11 = scmp.ne.s32.totalorder %s337_s15, %s269_s6  ;;  %p275_p13 = scmp.lt.s32.totalorder %s269_s6, %s269_s6 }
  0x1c   :  { %p276_p0 = por %p275_p13, %p274_p12 }
  0x1e   :  { %p277_p1 = pnand %p276_p0, %p270_p11 }
  0x20   :  { %280 = shalt.err (!%p277_p1)
}
  0x21   :  { %s311_s0 = smov 128   ;;  %s312_s7 = smov 8  }
  0x22   :  { %32 = dma.hbm_to_vmem [thread:$0]  %s384_s1, 2048, %s337_s15, [#allocation6], %s311_s0, %s311_s0, %s312_s7  }
  0x23   :  { %303 = dma.done.wait [#allocation3], 128  }
  0x24   :  { %304 = vsyncadd [#allocation3], 4294967168 }
  0x25   :  { %305 = dma.done.wait [#allocation6], 2048  }
  0x26   :  { %306 = vsyncadd [#allocation6], 4294965248  ;;  %v313_v0 = vmov 0.0|0.0   ;;  %vm314_vm0 = vmmov 0   ;;  %v315_v1 = vmov 0.0   ;;  %v42_v2 = vld [vmem:[#allocation5] sm:$0xff] }
  0x27   :  { %205 = vmatprep.subr.bf16.mxu0 %v313_v0  ;;  %202 = vmatprep.mubr.msk.f32.mxu0 %vm314_vm0, %v315_v1  ;;  %v43_v3 = vld [vmem:[#allocation5 + $0x8] sm:$0xff]  ;;  %v44_v5 = vld [vmem:[#allocation5 + $0x10] sm:$0xff]  ;;  %v45_v6 = vld [vmem:[#allocation5 + $0x18] sm:$0xff]  ;;  %s316_s11 = smov [#allocation7]  }
  0x28   :  { %v206_v4 = vpack.c.bf16 %v43_v3, %v42_v2  ;;  %v209_v7 = vpack.c.bf16 %v45_v6, %v44_v5  ;;  %v46_v8 = vld [vmem:[#allocation5 + $0x20] sm:$0xff]  ;;  %v47_v9 = vld [vmem:[#allocation5 + $0x28] sm:$0xff]  ;;  %v48_v11 = vld [vmem:[#allocation5 + $0x30] sm:$0xff]  ;;  %s142_s12 = sshll.u32 %s316_s11, 4  ;;  %s143_s12 = int_to_ptr.vmem [resolvable:$true] %s142_s12 }
  0x29   :  { %v212_v10 = vpack.c.bf16 %v47_v9, %v46_v8  ;;  %v49_v12 = vld [vmem:[#allocation5 + $0x38] sm:$0xff]  ;;  %v50_v14 = vld [vmem:[#allocation5 + $0x40] sm:$0xff]  ;;  %v51_v15 = vld [vmem:[#allocation5 + $0x48] sm:$0xff]  ;;  %s281_s13 = scalar_lea.vmem %s143_s12, 128  ;;  %p286_p3 = scmp.lt.s32.totalorder %s143_s12, %s143_s12 }
  0x2a   :  { %207 = vmatpush3.bf16.xpose.msra.mxu0 %v206_v4  ;;  %v215_v13 = vpack.c.bf16 %v49_v12, %v48_v11  ;;  %v218_v16 = vpack.c.bf16 %v51_v15, %v50_v14  ;;  %v52_v17 = vld [vmem:[#allocation5 + $0x50] sm:$0xff]  ;;  %v53_v18 = vld [vmem:[#allocation5 + $0x58] sm:$0xff]  ;;  %v54_v20 = vld [vmem:[#allocation5 + $0x60] sm:$0xff]  ;;  %p282_p2 = scmp.ne.s32.totalorder %s143_s12, %s281_s13  ;;  %p287_p4 = scmp.lt.s32.totalorder %s281_s13, %s281_s13 }
  0x2b   :  { %208 = vmatprep.subr.bf16.mxu0 %v313_v0  ;;  %v221_v19 = vpack.c.bf16 %v53_v18, %v52_v17  ;;  %v55_v21 = vld [vmem:[#allocation5 + $0x68] sm:$0xff]  ;;  %v56_v23 = vld [vmem:[#allocation5 + $0x70] sm:$0xff]  ;;  %v57_v24 = vld [vmem:[#allocation5 + $0x78] sm:$0xff] }
  0x2c   :  { %v224_v22 = vpack.c.bf16 %v55_v21, %v54_v20  ;;  %v227_v25 = vpack.c.bf16 %v57_v24, %v56_v23  ;;  %v41_v26 = vld [vmem:[#allocation2] sm:$0xff]  ;;  %p288_p5 = por %p287_p4, %p286_p3 }
  0x2d   :  { %v152_v27 = vld [vmem:[%s385_s2] ss:$0 sm:$0xff] }
  0x2e   :  { %p289_p6 = pnand %p288_p5, %p282_p2 }
  0x32   :  { %210 = vmatpush3.bf16.xpose.msra.mxu0 %v209_v7 }
  0x33   :  { %211 = vmatprep.subr.bf16.mxu0 %v313_v0 }
  0x3a   :  { %213 = vmatpush3.bf16.xpose.msra.mxu0 %v212_v10 }
  0x3b   :  { %214 = vmatprep.subr.bf16.mxu0 %v313_v0 }
  0x42   :  { %216 = vmatpush3.bf16.xpose.msra.mxu0 %v215_v13 }
  0x43   :  { %217 = vmatprep.subr.bf16.mxu0 %v313_v0 }
  0x4a   :  { %219 = vmatpush3.bf16.xpose.msra.mxu0 %v218_v16 }
  0x4b   :  { %220 = vmatprep.subr.bf16.mxu0 %v313_v0 }
  0x52   :  { %222 = vmatpush3.bf16.xpose.msra.mxu0 %v221_v19 }
  0x53   :  { %223 = vmatprep.subr.bf16.mxu0 %v313_v0 }
  0x5a   :  { %225 = vmatpush3.bf16.xpose.msra.mxu0 %v224_v22 }
  0x5b   :  { %226 = vmatprep.subr.bf16.mxu0 %v313_v0 }
  0x62   :  { %228 = vmatpush3.bf16.xpose.msra.mxu0 %v227_v25 }
  0x69   :  { %203 = vmatmul.mubr.f32.vlgmr.msra.gmra.mrb[0].mxu0 %v41_v26 }
 0x13c   :  { %v131_v28 = vpop.f32.mrb[0].mxu0 }
 0x13d   :  { %v132_v29 = vadd.f32 %v152_v27, %v131_v28  ;;  %v204_v30 = vpop.f32.mrb[1].mxu0 }
 0x13f   :  { %135 = vst [vmem:[#allocation7] sm:$0xff] %v132_v29 }
 0x140   :  { %292 = shalt.err (!%p289_p6)
}
 0x141   :  { %s293_s16 = scalar_lea.hbm %s386_s3, 128 }
 0x142   :  { %p294_p7 = scmp.ne.s32.totalorder %s386_s3, %s293_s16  ;;  %p297_p8 = scmp.lt.u32.totalorder %s293_s16, %s386_s3 }
 0x144   :  { %p299_p9 = pnand %p297_p8, %p294_p7 }
 0x146   :  { %302 = shalt.err (!%p299_p9)
}
 0x147   :  { %145 = dma.vmem_to_hbm [thread:$0]  %s143_s12, 128, %s386_s3, [#allocation4]  }
 0x148   :  { %307 = dma.done.wait [#allocation4], 128  }
 0x149   :  { %308 = vsyncadd [#allocation4], 4294967168 }
 0x14a   :  { %149 = vsyncpa [#allocation3], 1 }
 0x14b   :  { %150 = vsyncpa [#allocation6], 1 }
 0x14c   :  { %151 = vsyncpa [#allocation4], 1 }

</bundles_post_ra>
